<compile_context>
chip_gen: v6e
topology: v6e:2x2x1
jax: 0.10.0
libtpu: 0.0.40
codegen_flags: <defaults>
</compile_context>

<pallas_src>
import jax
import jax.numpy as jnp
from jax.experimental import pallas as pl
from jax.experimental.pallas import tpu as pltpu

LANE = 128
SUBLANE = 8

# Module dims (real module: input_dim=94399). Demo uses a smaller input dim
# but keeps the exact same tiled structure (multiple K and batch grid steps).
HIDDEN_DIM = 20
OUTPUT_DIM = 3
INPUT_DIM = 1024
BATCH = 32


def _round_up(n, m):
    return (n + m - 1) // m * m


def mlp_kernel(x_ref, w1_ref, b1_ref, w2_ref, b2_ref, o_ref, acc_ref):
    """One (batch tile, K tile) step of  y = relu(x @ W1 + b1) @ W2 + b2.

    Grid = (batch tiles, K tiles); the K (reduction) axis is last
    ("arbitrary") and accumulates fc1 into acc_ref (f32).  Bias + ReLU + fc2
    and the lane-dense output store run only on the final K step.
    """
    k = pl.program_id(1)

    @pl.when(k == 0)
    def _init():
        acc_ref[...] = jnp.zeros_like(acc_ref)

    # fc1 partial product: (tile_b, tile_k) @ (tile_k, H=20), f32 accumulate.
    # W1's hidden dim is unpadded in HBM; only the VMEM tile is lane-padded.
    acc_ref[...] += jnp.dot(
        x_ref[...], w1_ref[...], preferred_element_type=jnp.float32
    )

    @pl.when(k == pl.num_programs(1) - 1)
    def _epilogue():
        # Bias + ReLU in f32 vregs (v5e-safe: no bf16 VALU dependence).
        h = jnp.maximum(acc_ref[...] + b1_ref[...], 0.0)
        # fc2 on (H=20, O_pad=128) weights -> lane-dense 128-wide result.
        y = jnp.dot(h, w2_ref[...], preferred_element_type=jnp.float32)
        y = y + b2_ref[...]
        o_ref[...] = y.astype(o_ref.dtype)  # full-width (128-lane) store


def prepare_params(w1, b1, w2, b2, *, tile_k=8192, stream_dtype=None):
    """One-time weight preparation (hoisted out of the per-call forward).

    w1: (K, H), b1: (H,), w2: (H, O), b2: (O,)  -- weights stored (in, out),
    i.e. transposed vs. PyTorch's (out, in).

    * Pads K up to a multiple of tile_k with zero rows (exact: zero rows add
      nothing to the accumulator).
    * Pads only the OUTPUT dim of fc2 to 128 lanes (zero columns, sliced away
      by the wrapper) -> lane-dense output store, no leakage into real cols.
    * Optionally casts the streamed W1 to `stream_dtype` (e.g. bf16);
      accumulation in the kernel is always f32.
    """
    K, H = w1.shape
    O = w2.shape[1]

    tile_k = max(LANE, min(tile_k, _round_up(K, LANE)))
    tile_k = _round_up(tile_k, LANE)
    K_pad = _round_up(K, tile_k)
    O_pad = _round_up(max(O, 1), LANE)

    w_dtype = w1.dtype if stream_dtype is None else stream_dtype

    w1_p = jnp.zeros((K_pad, H), w_dtype).at[:K, :].set(w1.astype(w_dtype))
    b1_p = b1.astype(jnp.float32).reshape(1, H)
    w2_p = jnp.zeros((H, O_pad), jnp.float32).at[:, :O].set(w2.astype(jnp.float32))
    b2_p = jnp.zeros((1, O_pad), jnp.float32).at[0, :O].set(b2.astype(jnp.float32))

    return {
        "w1": w1_p, "b1": b1_p, "w2": w2_p, "b2": b2_p,
        "tile_k": tile_k, "K": K, "H": H, "O": O, "O_pad": O_pad,
        "stream_dtype": w_dtype,
    }


def neural_network_forward(x, params, *, tile_b=16):
    """Forward pass of NeuralNetwork (Linear -> ReLU -> Linear) on prepared params.

    x: (B, K).  Returns (B, O) float32.
    """
    B, K = x.shape
    assert K == params["K"], "input feature dim mismatch"
    tile_k = params["tile_k"]
    K_pad = params["w1"].shape[0]
    H = params["H"]
    O = params["O"]
    O_pad = params["O_pad"]
    in_dtype = params["stream_dtype"]

    # tile_b=16 default -> the real B=32 gives 2 batch tiles so the "parallel"
    # axis actually shards across v7x's two TensorCores.
    tile_b = max(SUBLANE, min(tile_b, _round_up(B, SUBLANE)))
    tile_b = _round_up(tile_b, SUBLANE)
    B_pad = _round_up(B, tile_b)

    # Only x is padded per call (cheap); weights were prepared once.
    x_p = jnp.zeros((B_pad, K_pad), in_dtype).at[:B, :K].set(x.astype(in_dtype))

    grid = (B_pad // tile_b, K_pad // tile_k)  # batch first, K (reduction) last

    out_pad = pl.pallas_call(
        mlp_kernel,
        out_shape=jax.ShapeDtypeStruct((B_pad, O_pad), jnp.float32),
        grid=grid,
        in_specs=[
            pl.BlockSpec((tile_b, tile_k), lambda i, k: (i, k)),  # x chunk
            pl.BlockSpec((tile_k, H), lambda i, k: (k, 0)),       # W1 chunk (H unpadded)
            pl.BlockSpec((1, H), lambda i, k: (0, 0)),            # b1 (resident)
            pl.BlockSpec((H, O_pad), lambda i, k: (0, 0)),        # W2 (resident)
            pl.BlockSpec((1, O_pad), lambda i, k: (0, 0)),        # b2 (resident)
        ],
        out_specs=pl.BlockSpec((tile_b, O_pad), lambda i, k: (i, 0)),
        scratch_shapes=[pltpu.VMEM((tile_b, H), jnp.float32)],
        compiler_params=pltpu.CompilerParams(
            dimension_semantics=("parallel", "arbitrary"),
            # Double-buffered tiles at tile_k=8192 total ~10 MiB; leave headroom
            # on v7x (64 MiB physical) while still allowing big K tiles.
            vmem_limit_bytes=32 * 1024 * 1024,
        ),
    )(x_p, params["w1"], params["b1"], params["w2"], params["b2"])

    return out_pad[:B, :O]


def init_params(key, input_dim, hidden_dim, output_dim):
    """nn.Linear-style init: U(-1/sqrt(fan_in), 1/sqrt(fan_in)); weights (in, out)."""
    k1, k2, k3, k4 = jax.random.split(key, 4)
    bound1 = 1.0 / jnp.sqrt(input_dim)
    bound2 = 1.0 / jnp.sqrt(hidden_dim)
    w1 = jax.random.uniform(k1, (input_dim, hidden_dim), jnp.float32, -bound1, bound1)
    b1 = jax.random.uniform(k2, (hidden_dim,), jnp.float32, -bound1, bound1)
    w2 = jax.random.uniform(k3, (hidden_dim, output_dim), jnp.float32, -bound2, bound2)
    b2 = jax.random.uniform(k4, (output_dim,), jnp.float32, -bound2, bound2)
    return w1, b1, w2, b2


if __name__ == "__main__":
    key = jax.random.PRNGKey(0)
    kx, kp = jax.random.split(key)
    x = jax.random.normal(kx, (BATCH, INPUT_DIM), jnp.float32)
    w1, b1, w2, b2 = init_params(kp, INPUT_DIM, HIDDEN_DIM, OUTPUT_DIM)

    ref = jnp.maximum(x @ w1 + b1, 0.0) @ w2 + b2

    # Demo tiles chosen so both grid axes have multiple steps:
    # (32/16 batch tiles, 1024/256 K tiles) = (2, 4).
    # At the real size, use prepare_params(..., tile_k=8192) once and reuse.
    params_f32 = prepare_params(w1, b1, w2, b2, tile_k=256)
    out = neural_network_forward(x, params_f32, tile_b=16)
    out = jax.block_until_ready(out)
    assert out.shape == (BATCH, OUTPUT_DIM)
    assert jnp.allclose(out, ref, atol=1e-4, rtol=1e-4)

    # bf16 streaming of x / W1 (memory-bandwidth win; f32 accumulation).
    # TODO(synk): validate bf16 streaming error at the full K=94399 before
    # making it the default (per review's accumulation-error concern).
    params_bf16 = prepare_params(w1, b1, w2, b2, tile_k=256,
                                 stream_dtype=jnp.bfloat16)
    out_bf16 = neural_network_forward(x, params_bf16, tile_b=16)
    out_bf16 = jax.block_until_ready(out_bf16)
    assert out_bf16.shape == (BATCH, OUTPUT_DIM)
    assert jnp.allclose(out_bf16, ref, atol=5e-2, rtol=5e-2)

    print("KERNEL_OK")
</pallas_src>

<mosaic_0001>
module attributes {stable_mosaic.version = 11 : i64} {
  func.func @mlp_kernel(%arg0: i32, %arg1: i32, %arg2: memref<16x256xf32, #tpu.memory_space<vmem>>, %arg3: memref<256x20xf32, #tpu.memory_space<vmem>>, %arg4: memref<1x20xf32, #tpu.memory_space<vmem>>, %arg5: memref<20x128xf32, #tpu.memory_space<vmem>>, %arg6: memref<1x128xf32, #tpu.memory_space<vmem>>, %arg7: memref<16x128xf32, #tpu.memory_space<vmem>>, %arg8: memref<16x20xf32, #tpu.memory_space<vmem>>) attributes {dimension_semantics = [#tpu.dimension_semantics<parallel>, #tpu.dimension_semantics<arbitrary>], iteration_bounds = array<i64: 2, 4>, scalar_prefetch = 0 : i64, scratch_operands = 1 : i64, tpu.core_type = #tpu.core_type<tc>, window_params = [{transform_indices = @transform_0, window_bounds = array<i64: 16, 256>}, {transform_indices = @transform_1, window_bounds = array<i64: 256, 20>}, {pipeline_mode = #tpu.pipeline_mode<synchronous>, transform_indices = @transform_2, window_bounds = array<i64: 1, 20>}, {pipeline_mode = #tpu.pipeline_mode<synchronous>, transform_indices = @transform_3, window_bounds = array<i64: 20, 128>}, {pipeline_mode = #tpu.pipeline_mode<synchronous>, transform_indices = @transform_4, window_bounds = array<i64: 1, 128>}, {transform_indices = @transform_5, window_bounds = array<i64: 16, 128>}]} {
    %c0_i32 = arith.constant 0 : i32
    %0 = arith.cmpi eq, %arg1, %c0_i32 : i32
    %1 = arith.extui %0 : i1 to i32
    %c0_i32_0 = arith.constant 0 : i32
    %2 = arith.cmpi ne, %1, %c0_i32_0 : i32
    scf.if %2 {
      %cst_9 = arith.constant 0.000000e+00 : f32
      %12 = vector.broadcast %cst_9 : f32 to vector<16x20xf32>
      %c0_10 = arith.constant 0 : index
      %c0_11 = arith.constant 0 : index
      %13 = vector.load %arg8[%c0_10, %c0_11] : memref<16x20xf32, #tpu.memory_space<vmem>>, vector<16x20xf32>
      tpu.vector_store %arg8[%c0_10, %c0_11], %12 {strides = array<i32>} : memref<16x20xf32, #tpu.memory_space<vmem>>, vector<16x20xf32>,
    } else {
    }
    %c0 = arith.constant 0 : index
    %c0_1 = arith.constant 0 : index
    %3 = vector.load %arg8[%c0, %c0_1] : memref<16x20xf32, #tpu.memory_space<vmem>>, vector<16x20xf32>
    %c0_2 = arith.constant 0 : index
    %c0_3 = arith.constant 0 : index
    %4 = vector.load %arg2[%c0_2, %c0_3] : memref<16x256xf32, #tpu.memory_space<vmem>>, vector<16x256xf32>
    %c0_4 = arith.constant 0 : index
    %c0_5 = arith.constant 0 : index
    %5 = vector.load %arg3[%c0_4, %c0_5] : memref<256x20xf32, #tpu.memory_space<vmem>>, vector<256x20xf32>
    %cst = arith.constant dense<0.000000e+00> : vector<16x20xf32>
    %6 = tpu.matmul %4, %5, %cst {dimension_numbers = #tpu.dot_dimension_numbers<[1], [0], [0], [1], [0, 0, 1, 1], [], []>} : vector<16x256xf32>, vector<256x20xf32>, vector<16x20xf32> -> vector<16x20xf32>
    %7 = arith.addf %3, %6 : vector<16x20xf32>
    %c0_6 = arith.constant 0 : index
    %c0_7 = arith.constant 0 : index
    %8 = vector.load %arg8[%c0_6, %c0_7] : memref<16x20xf32, #tpu.memory_space<vmem>>, vector<16x20xf32>
    tpu.vector_store %arg8[%c0_6, %c0_7], %7 {strides = array<i32>} : memref<16x20xf32, #tpu.memory_space<vmem>>, vector<16x20xf32>,
    %c3_i32 = arith.constant 3 : i32
    %9 = arith.cmpi eq, %arg1, %c3_i32 : i32
    %10 = arith.extui %9 : i1 to i32
    %c0_i32_8 = arith.constant 0 : i32
    %11 = arith.cmpi ne, %10, %c0_i32_8 : i32
    scf.if %11 {
      %c0_9 = arith.constant 0 : index
      %c0_10 = arith.constant 0 : index
      %12 = vector.load %arg8[%c0_9, %c0_10] : memref<16x20xf32, #tpu.memory_space<vmem>>, vector<16x20xf32>
      %c0_11 = arith.constant 0 : index
      %c0_12 = arith.constant 0 : index
      %13 = vector.load %arg4[%c0_11, %c0_12] : memref<1x20xf32, #tpu.memory_space<vmem>>, vector<1x20xf32>
      %14 = vector.broadcast %13 : vector<1x20xf32> to vector<16x20xf32>
      %15 = arith.addf %12, %14 : vector<16x20xf32>
      %cst_13 = arith.constant 0.000000e+00 : f32
      %16 = vector.broadcast %cst_13 : f32 to vector<16x20xf32>
      %17 = arith.maximumf %15, %16 : vector<16x20xf32>
      %c0_14 = arith.constant 0 : index
      %c0_15 = arith.constant 0 : index
      %18 = vector.load %arg5[%c0_14, %c0_15] : memref<20x128xf32, #tpu.memory_space<vmem>>, vector<20x128xf32>
      %cst_16 = arith.constant dense<0.000000e+00> : vector<16x128xf32>
      %19 = tpu.matmul %17, %18, %cst_16 {dimension_numbers = #tpu.dot_dimension_numbers<[1], [0], [0], [1], [0, 0, 1, 1], [], []>} : vector<16x20xf32>, vector<20x128xf32>, vector<16x128xf32> -> vector<16x128xf32>
      %c0_17 = arith.constant 0 : index
      %c0_18 = arith.constant 0 : index
      %20 = vector.load %arg6[%c0_17, %c0_18] : memref<1x128xf32, #tpu.memory_space<vmem>>, vector<1x128xf32>
      %21 = vector.broadcast %20 : vector<1x128xf32> to vector<16x128xf32>
      %22 = arith.addf %19, %21 : vector<16x128xf32>
      %c0_19 = arith.constant 0 : index
      %c0_20 = arith.constant 0 : index
      %23 = vector.load %arg7[%c0_19, %c0_20] : memref<16x128xf32, #tpu.memory_space<vmem>>, vector<16x128xf32>
      tpu.vector_store %arg7[%c0_19, %c0_20], %22 {strides = array<i32>} : memref<16x128xf32, #tpu.memory_space<vmem>>, vector<16x128xf32>,
    } else {
    }
    return
  }
  func.func @transform_0(%arg0: i32, %arg1: i32) -> (i32, i32) {
    %c0_i32 = arith.constant 0 : i32
    return %arg0, %arg1 : i32, i32
  }
  func.func @transform_1(%arg0: i32, %arg1: i32) -> (i32, i32) {
    %c0_i32 = arith.constant 0 : i32
    %c0_i32_0 = arith.constant 0 : i32
    return %arg1, %c0_i32 : i32, i32
  }
  func.func @transform_2(%arg0: i32, %arg1: i32) -> (i32, i32) {
    %c0_i32 = arith.constant 0 : i32
    %c0_i32_0 = arith.constant 0 : i32
    %c0_i32_1 = arith.constant 0 : i32
    return %c0_i32, %c0_i32_0 : i32, i32
  }
  func.func @transform_3(%arg0: i32, %arg1: i32) -> (i32, i32) {
    %c0_i32 = arith.constant 0 : i32
    %c0_i32_0 = arith.constant 0 : i32
    %c0_i32_1 = arith.constant 0 : i32
    return %c0_i32, %c0_i32_0 : i32, i32
  }
  func.func @transform_4(%arg0: i32, %arg1: i32) -> (i32, i32) {
    %c0_i32 = arith.constant 0 : i32
    %c0_i32_0 = arith.constant 0 : i32
    %c0_i32_1 = arith.constant 0 : i32
    return %c0_i32, %c0_i32_0 : i32, i32
  }
  func.func @transform_5(%arg0: i32, %arg1: i32) -> (i32, i32) {
    %c0_i32 = arith.constant 0 : i32
    %c0_i32_0 = arith.constant 0 : i32
    return %arg0, %c0_i32 : i32, i32
  }
}

</mosaic_0001>

<bundles_post_ra>
// kernel: tpu_custom_call.1
= control target key start
LH: loop header
LB: loop body
LE: loop exit
PB: predicated region body
PF: predicated region fallthrough
CT: control target
= control target key end

     0   :  { %10 = vsyncpa [#allocation5], 0  ;;  %s1226_s0 = inlined_call_operand.vmem [shape: f32[32,1024], index: 0, kind: input, shape index: {}]   ;;  %s1227_s1 = inlined_call_operand.vmem [shape: f32[1024,20], index: 1, kind: input, shape index: {}]   ;;  %s1228_s2 = inlined_call_operand.vmem [shape: f32[1,20], index: 2, kind: input, shape index: {}]   ;;  %s1229_s3 = inlined_call_operand.vmem [shape: f32[20,128], index: 3, kind: input, shape index: {}]   ;;  %s1230_s4 = inlined_call_operand.vmem [shape: f32[1,128], index: 4, kind: input, shape index: {}]   ;;  %s1231_s5 = inlined_call_operand.hbm [shape: f32[32,128], index: 5, kind: output, shape index: {}]  }
   0x1   :  { %12 = vsyncpa [#allocation5 + $0x1], 0  ;;  %s984_s18 = smov 0   ;;  %s986_s19 = smov 0  }
   0x2   :  { %s988_s20 = smov 0   ;;  %s990_s21 = smov 0  }
   0x3   :  { %s992_s22 = smov 0   ;;  %s994_s23 = smov 0  }
   0x4   :  { %s996_s24 = smov 0   ;;  %s998_s25 = smov 0  }
   0x5   :  { %s1000_s26 = smov 0   ;;  %s1002_s27 = smov 0  }
   0x6 LB: > { %s638_s28 = sadd.s32 4294967295, %s948_s27   ;;  %s639_s29 = sadd.s32 4294967294, %s948_s27   ;;  %s948_s27 = sphi %s1002_s27, %s18_s27   ;;  %s944_s26 = sphi %s1000_s26, %s1249_s26   ;;  %s940_s25 = sphi %s998_s25, %s1248_s25   ;;  %s936_s24 = sphi %s996_s24, %s1247_s24   ;;  %s932_s23 = sphi %s994_s23, %s1246_s23   ;;  %s928_s22 = sphi %s992_s22, %s1245_s22   ;;  %s924_s21 = sphi %s990_s21, %s1244_s21   ;;  %s920_s20 = sphi %s988_s20, %s1243_s20   ;;  %s916_s19 = sphi %s986_s19, %s1242_s19   ;;  %s912_s18 = sphi %s984_s18, %s1241_s18  }
   0x7   : > { %s27_s30 = sadd.s32 1, %s940_s25  ;;  %s30_s6 = sadd.s32 1, %s944_s26 }
   0x8   : > { %p28_p0 = scmp.ge.s32.totalorder %s27_s30, 4  ;;  %s39_s7 = sadd.s32 1, %s928_s22 }
   0x9   : > { %p46_p1 = scmp.ne.s32.totalorder %s928_s22, %s924_s21  ;;  %p47_p2 = scmp.eq.s32.totalorder %s948_s27, 0 }
   0xa   : > { %s1251_s30 = smov (%p28_p0, %s27_s30), 0  ;;  %s1253_s6 = smov (!%p28_p0, %s30_s6), %s944_s26 }
   0xb   : > { %1234 = sst [smem:[#allocation7_spill]] %s1251_s30  ;;  %s35_s8 = ssub.s32 %s940_s25, %s1251_s30 }
   0xc   : > { %p1047_p3 = por %p47_p2, %p46_p1  ;;  %p32_p4 = scmp.ge.s32.totalorder %s1253_s6, 2 }
   0xd   : > { %s154_s10 = sadd.s32 1, %s920_s20  ;;  %p164_p5 = scmp.ne.s32.totalorder %s920_s20, %s916_s19 }
   0xe   : > { %p165_p6 = scmp.eq.s32.totalorder %s638_s28, 7  ;;  %s1255_s6 = smov (%p32_p4, %s1253_s6), 0 }
   0xf   : > { %1236 = sst [smem:[#allocation8_spill]] %s1255_s6  ;;  %p170_p8 = scmp.ne.s32.totalorder %s916_s19, %s912_s18 }
  0x10   : > { %p1056_p7 = por %p165_p6, %p164_p5  ;;  %s34_s12 = ssub.s32 %s944_s26, %s1255_s6 }
  0x11   : > { %p171_p9 = scmp.eq.s32.totalorder %s639_s29, 7  ;;  %s36_s13 = sor.u32 %s35_s8, %s34_s12 }
  0x12   : > { %p152_p10 = scmp.eq.s32.totalorder %s34_s12, 0  ;;  %p37_p11 = scmp.eq.s32.totalorder %s36_s13, 0 }
  0x13   : > { %p1064_p12 = por %p171_p9, %p170_p8  ;;  %p641_p13 = scmp.ge.s32.totalorder %s948_s27, 8 }
  0x14   : > { %s1069_s15 = scalar_select %p152_p10, %s920_s20, %s154_s10  }
  0x15   : > { %s1072_s16 = scalar_select %p37_p11, %s928_s22, %s39_s7  }
  0x16   : > { %196 = sbr.rel (%p641_p13) target bundleno = 36 (0x24), region = 28 }
  0x1b   : > { %199 = sbr.rel (!%p1047_p3) target bundleno = 36 (0x24), region = 32  ;;  %s201_s17 = sand.u32 (%p1047_p3), 1, %s928_s22  }
  0x1c   : > { %s644_s28 = sshll.u32 (%p1047_p3), %s940_s25, 1  ;;  %s642_s29 = sshll.u32 (%p1047_p3), %s201_s17, 5 }
  0x1d   : > { %s664_s8 = sshll.u32 (%p1047_p3), %s944_s26, 4  ;;  %s203_s30 = scalar_lea.vmem (%p1047_p3), [#allocation3], %s642_s29 }
  0x1e   : > { %s207_s12 = sadd.s32 (%p1047_p3), %s664_s8, %s644_s28 }
  0x1f   : > { %s646_s13 = sshll.u32 (%p1047_p3), %s207_s12, 3 }
  0x20   : > { %s209_s7 = scalar_lea.vmem %s1226_s0, %s646_s13 }
  0x21   : > { %v222_v0 = vld [vmem:[%s209_s7] sm:$0xff]  ;;  %v224_v1 = vld [vmem:[%s209_s7 + $0x8] sm:$0xff] }
  0x22   : > { %v226_v2 = vld [vmem:[%s209_s7 + $0x40] sm:$0xff]  ;;  %223 = vst [vmem:[%s203_s30] sm:$0xff] %v222_v0  ;;  %225 = vst [vmem:[%s203_s30 + $0x8] sm:$0xff] %v224_v1  ;;  %v228_v3 = vld [vmem:[%s209_s7 + $0x48] sm:$0xff] }
  0x23   : > { %227 = vst [vmem:[%s203_s30 + $0x10] sm:$0xff] %v226_v2  ;;  %229 = vst [vmem:[%s203_s30 + $0x18] sm:$0xff] %v228_v3 }
  0x24 PF: > { %p647_p0 = scmp.ge.s32.totalorder %s948_s27, 1  ;;  %p243_p1 = scmp.lt.s32.totalorder %s948_s27, 9 }
  0x26   : > { %p244_p2 = pnand %p647_p0, %p243_p1 }
  0x27   : > { %s250_s6 = sand.u32 (!%p244_p2), 1, %s924_s21   ;;  %s279_s9 = sand.u32 (!%p244_p2), 1, %s916_s19  }
  0x28   : > { %247 = sbr.rel (%p244_p2) target bundleno = 520 (0x208), region = 59  ;;  %s648_s17 = sshll.u32 (!%p244_p2), %s250_s6, 5 }
  0x29   : > { %s649_s28 = sshll.u32 (!%p244_p2), %s279_s9, 4  ;;  %s650_s29 = sshll.u32 (!%p244_p2), %s932_s23, 5 }
  0x2a   : > { %p285_p3 = scmp.lt.s32.totalorder (!%p244_p2), %s650_s29, 127  ;;  %s1095_s10 = scalar_lea.vmem (!%p244_p2), [#allocation3], %s648_s17 }
  0x2b   : > { %s1097_s7 = scalar_lea.vmem (!%p244_p2), [#allocation4], %s649_s28  ;;  %p652_p4 = scmp.ne.s32.totalorder (!%p244_p2), %s932_s23, 0 }
  0x2d   : > { %s1257_s29 = smov (!%p285_p3, %s650_s29), 127  ;;  %294 = sbr.rel (%p652_p4) target bundleno = 52 (0x34), region = 67 }
  0x2e   : > { %s651_s30 = sshll.u32 %s1257_s29, 3 }
  0x2f   : > { %s1093_s13 = scalar_lea.vmem %s1227_s1, %s651_s30 }
  0x32   : > { %vm295_vm0 = vcmask 162816   ;;  %v950_v4 = vmov 0.0  }
  0x33   : > { %296 = vst.msk [vmem:[#allocation2] sm:$0xff] %vm295_vm0, %v950_v4  ;;  %297 = vst.msk [vmem:[#allocation2 + $0x8] sm:$0xff] %vm295_vm0, %v950_v4 }
  0x34 PF: > { %v335_v5 = vld [vmem:[%s1093_s13 + $0xf8] sm:$0xff]  ;;  %v334_v7 = vld [vmem:[%s1093_s13 + $0xf0] sm:$0xff]  ;;  %v333_v9 = vld [vmem:[%s1093_s13 + $0xe8] sm:$0xff]  ;;  %vm413_vm1 = vcmask 162816   ;;  %p653_p5 = scmp.ne.s32.totalorder %s932_s23, 3 }
  0x35   : > { %v319_v6 = vld [vmem:[%s1093_s13 + $0x78] sm:$0xff]  ;;  %666 = vmatprep.subr.mxu0 %v335_v5  ;;  %718 = vmatprep.subr.mxu1 %v335_v5  ;;  %v318_v8 = vld [vmem:[%s1093_s13 + $0x70] sm:$0xff]  ;;  %v317_v10 = vld [vmem:[%s1093_s13 + $0x68] sm:$0xff] }
  0x36   : > { %667 = vmatpush3.msra.mxu0 %v319_v6  ;;  %734 = vmatpush3.msra.mxu1 %v319_v6  ;;  %v332_v11 = vld [vmem:[%s1093_s13 + $0xe0] sm:$0xff]  ;;  %v331_v13 = vld [vmem:[%s1093_s13 + $0xd8] sm:$0xff]  ;;  %v330_v15 = vld [vmem:[%s1093_s13 + $0xd0] sm:$0xff] }
  0x37   : > { %668 = vmatprep.subr.mxu0 %v334_v7  ;;  %719 = vmatprep.subr.mxu1 %v334_v7  ;;  %v316_v12 = vld [vmem:[%s1093_s13 + $0x60] sm:$0xff]  ;;  %v315_v14 = vld [vmem:[%s1093_s13 + $0x58] sm:$0xff]  ;;  %v314_v16 = vld [vmem:[%s1093_s13 + $0x50] sm:$0xff] }
  0x38   : > { %669 = vmatpush3.msra.mxu0 %v318_v8  ;;  %735 = vmatpush3.msra.mxu1 %v318_v8  ;;  %v329_v17 = vld [vmem:[%s1093_s13 + $0xc8] sm:$0xff]  ;;  %v328_v19 = vld [vmem:[%s1093_s13 + $0xc0] sm:$0xff]  ;;  %v327_v21 = vld [vmem:[%s1093_s13 + $0xb8] sm:$0xff] }
  0x39   : > { %670 = vmatprep.subr.mxu0 %v333_v9  ;;  %720 = vmatprep.subr.mxu1 %v333_v9  ;;  %v313_v18 = vld [vmem:[%s1093_s13 + $0x48] sm:$0xff]  ;;  %v312_v20 = vld [vmem:[%s1093_s13 + $0x40] sm:$0xff]  ;;  %v311_v22 = vld [vmem:[%s1093_s13 + $0x38] sm:$0xff] }
  0x3a   : > { %671 = vmatpush3.msra.mxu0 %v317_v10  ;;  %736 = vmatpush3.msra.mxu1 %v317_v10  ;;  %v326_v23 = vld [vmem:[%s1093_s13 + $0xb0] sm:$0xff]  ;;  %v325_v25 = vld [vmem:[%s1093_s13 + $0xa8] sm:$0xff]  ;;  %v324_v27 = vld [vmem:[%s1093_s13 + $0xa0] sm:$0xff] }
  0x3b   : > { %672 = vmatprep.subr.mxu0 %v332_v11  ;;  %721 = vmatprep.subr.mxu1 %v332_v11  ;;  %v310_v24 = vld [vmem:[%s1093_s13 + $0x30] sm:$0xff]  ;;  %v309_v26 = vld [vmem:[%s1093_s13 + $0x28] sm:$0xff]  ;;  %v308_v28 = vld [vmem:[%s1093_s13 + $0x20] sm:$0xff] }
  0x3c   : > { %673 = vmatpush3.msra.mxu0 %v316_v12  ;;  %737 = vmatpush3.msra.mxu1 %v316_v12  ;;  %v323_v29 = vld [vmem:[%s1093_s13 + $0x98] sm:$0xff]  ;;  %v322_v31 = vld [vmem:[%s1093_s13 + $0x90] sm:$0xff]  ;;  %v321_v33 = vld [vmem:[%s1093_s13 + $0x88] sm:$0xff] }
  0x3d   : > { %674 = vmatprep.subr.mxu0 %v331_v13  ;;  %722 = vmatprep.subr.mxu1 %v331_v13  ;;  %v307_v30 = vld [vmem:[%s1093_s13 + $0x18] sm:$0xff]  ;;  %v306_v32 = vld [vmem:[%s1093_s13 + $0x10] sm:$0xff]  ;;  %v305_v34 = vld [vmem:[%s1093_s13 + $0x8] sm:$0xff] }
  0x3e   : > { %675 = vmatpush3.msra.mxu0 %v315_v14  ;;  %738 = vmatpush3.msra.mxu1 %v315_v14  ;;  %v320_v35 = vld [vmem:[%s1093_s13 + $0x80] sm:$0xff]  ;;  %v301_v37 = vld [vmem:[%s1095_s10 + $0x8] sm:$0xff]  ;;  %v303_v38 = vld [vmem:[%s1095_s10 + $0x18] sm:$0xff] }
  0x3f   : > { %676 = vmatprep.subr.mxu0 %v330_v15  ;;  %723 = vmatprep.subr.mxu1 %v330_v15  ;;  %v304_v36 = vld [vmem:[%s1093_s13] sm:$0xff]  ;;  %v300_v39 = vld [vmem:[%s1095_s10] sm:$0xff]  ;;  %v299_v45 = vld [vmem:[#allocation2 + $0x8] sm:$0xff] }
  0x40   : > { %677 = vmatpush3.msra.mxu0 %v314_v16  ;;  %739 = vmatpush3.msra.mxu1 %v314_v16  ;;  %v302_v40 = vld [vmem:[%s1095_s10 + $0x10] sm:$0xff] }
  0x41   : > { %678 = vmatprep.subr.mxu0 %v329_v17  ;;  %724 = vmatprep.subr.mxu1 %v329_v17  ;;  %v298_v43 = vld [vmem:[#allocation2] sm:$0xff] }
  0x42   : > { %679 = vmatpush3.msra.mxu0 %v313_v18  ;;  %740 = vmatpush3.msra.mxu1 %v313_v18 }
  0x43   : > { %680 = vmatprep.subr.mxu0 %v328_v19  ;;  %725 = vmatprep.subr.mxu1 %v328_v19 }
  0x44   : > { %681 = vmatpush3.msra.mxu0 %v312_v20  ;;  %741 = vmatpush3.msra.mxu1 %v312_v20 }
  0x45   : > { %682 = vmatprep.subr.mxu0 %v327_v21  ;;  %726 = vmatprep.subr.mxu1 %v327_v21 }
  0x46   : > { %683 = vmatpush3.msra.mxu0 %v311_v22  ;;  %742 = vmatpush3.msra.mxu1 %v311_v22 }
  0x47   : > { %684 = vmatprep.subr.mxu0 %v326_v23  ;;  %727 = vmatprep.subr.mxu1 %v326_v23 }
  0x48   : > { %685 = vmatpush3.msra.mxu0 %v310_v24  ;;  %743 = vmatpush3.msra.mxu1 %v310_v24 }
  0x49   : > { %686 = vmatprep.subr.mxu0 %v325_v25  ;;  %728 = vmatprep.subr.mxu1 %v325_v25 }
  0x4a   : > { %687 = vmatpush3.msra.mxu0 %v309_v26  ;;  %744 = vmatpush3.msra.mxu1 %v309_v26 }
  0x4b   : > { %688 = vmatprep.subr.mxu0 %v324_v27  ;;  %729 = vmatprep.subr.mxu1 %v324_v27 }
  0x4c   : > { %689 = vmatpush3.msra.mxu0 %v308_v28  ;;  %745 = vmatpush3.msra.mxu1 %v308_v28 }
  0x4d   : > { %690 = vmatprep.subr.mxu0 %v323_v29  ;;  %730 = vmatprep.subr.mxu1 %v323_v29 }
  0x4e   : > { %691 = vmatpush3.msra.mxu0 %v307_v30  ;;  %746 = vmatpush3.msra.mxu1 %v307_v30 }
  0x4f   : > { %692 = vmatprep.subr.mxu0 %v322_v31  ;;  %731 = vmatprep.subr.mxu1 %v322_v31 }
  0x50   : > { %693 = vmatpush3.msra.mxu0 %v306_v32  ;;  %747 = vmatpush3.msra.mxu1 %v306_v32 }
  0x51   : > { %694 = vmatprep.subr.mxu0 %v321_v33  ;;  %732 = vmatprep.subr.mxu1 %v321_v33 }
  0x52   : > { %695 = vmatpush3.msra.mxu0 %v305_v34  ;;  %748 = vmatpush3.msra.mxu1 %v305_v34 }
  0x53   : > { %696 = vmatprep.subr.mxu0 %v320_v35  ;;  %733 = vmatprep.subr.mxu1 %v320_v35 }
  0x54   : > { %697 = vmatpush3.msra.mxu0 %v304_v36  ;;  %749 = vmatpush3.msra.mxu1 %v304_v36 }
  0x55   : > { %400 = vmatprep.mubr.f32.mxu0 %v301_v37  ;;  %405 = vmatprep.mubr.f32.mxu1 %v303_v38 }
  0x56   : > { %401 = vmatmul.mubr.f32.vlgmr.msra.gmra.mxu0 %v300_v39  ;;  %406 = vmatmul.mubr.f32.vlgmr.msra.gmra.mxu1 %v302_v40 }
 0x116   : > { %v698_v41 = vpop.f32.mrf.mxu0  ;;  %v701_v42 = vpop.f32.mrf.mxu1 }
 0x118   : > { %v699_v44 = vpop.f32.mrf.mxu0  ;;  %v702_v46 = vpop.f32.mrf.mxu1 }
 0x119   : > { %v700_v47 = vadd.f32 %v699_v44, %v698_v41  ;;  %v703_v48 = vadd.f32 %v702_v46, %v701_v42  ;;  %419 = sbr.rel (%p653_p5) target bundleno = 496 (0x1f0), region = 71 }
 0x11b   : > { %v411_v49 = vadd.f32 %v700_v47, %v298_v43  ;;  %v412_v50 = vadd.f32 %v703_v48, %v299_v45 }
 0x11d   : > { %414 = vst.msk [vmem:[#allocation2] sm:$0xff] %vm413_vm1, %v411_v49  ;;  %415 = vst.msk [vmem:[#allocation2 + $0x8] sm:$0xff] %vm413_vm1, %v412_v50 }
 0x11e   : > { %v435_v51 = vld [vmem:[%s1229_s3 + $0x10] sm:$0xf]  ;;  %vm449_vm2 = vcmask 1043456   ;;  %v434_v52 = vld [vmem:[%s1229_s3 + $0x8] sm:$0xff]  ;;  %v654_v55 = vld [vmem:[%s1228_s2] ss:$0 sm:$0xff] }
 0x11f   : > { %709 = vmatprep.subr.msk.mxu0 %vm449_vm2, %v435_v51  ;;  %v433_v56 = vld [vmem:[%s1229_s3] sm:$0xff] }
 0x120   : > { %710 = vmatpush3.msk.msra.mxu0 %vm449_vm2, %v435_v51  ;;  %v655_v61 = vld [vmem:[%s1230_s4] ss:$0 sm:$0xff] }
 0x121   : > { %711 = vmatprep.subr.mxu0 %v434_v52 }
 0x122   : > { %712 = vmatpush3.msra.mxu0 %v434_v52 }
 0x123   : > { %713 = vmatprep.subr.mxu0 %v433_v56 }
 0x124   : > { %v420_v53 = vld [vmem:[#allocation2] sm:$0xff]  ;;  %v421_v54 = vld [vmem:[#allocation2 + $0x8] sm:$0xff]  ;;  %714 = vmatpush3.msra.mxu0 %v433_v56 }
 0x125   : > { %v429_v57 = vadd.f32 %v654_v55, %v420_v53  ;;  %v430_v58 = vadd.f32 %v654_v55, %v421_v54 }
 0x127   : > { %v431_v59 = vmax.f32 %v429_v57, 0.0  ;;  %v432_v60 = vmax.f32 %v430_v58, 0.0 }
 0x129   : > { %715 = vmatprep.mubr.msk.f32.mxu0 %vm413_vm1, %v431_v59 }
 0x12a   : > { %716 = vmatmul.mubr.msk.f32.vlgmr.msra.gmra.mxu0 %vm413_vm1, %v432_v60 }
 0x1ea   : > { %v717_v62 = vpop.f32.mrf.mxu0 }
 0x1eb   : > { %v525_v63 = vadd.f32 %v717_v62, %v655_v61 }
 0x1ec   : > { %v519_v0 = vpop.f32.mrf.mxu0 }
 0x1ed   : > { %529 = vst [vmem:[%s1097_s7 + $0x8] sm:$0xff] %v525_v63  ;;  %v520_v1 = vadd.f32 %v655_v61, %v519_v0 }
 0x1ef   : > { %528 = vst [vmem:[%s1097_s7] sm:$0xff] %v520_v1 }
 0x1f0 PF: > { %s665_s10 = sshll.u32 %s936_s24, 8  ;;  %s544_s28 = sshll.u32 %s1097_s7, 4  ;;  %s1165_s28 = int_to_ptr.vmem [resolvable:$true] %s544_s28 }
 0x1f1   : > { %s1162_s17 = scalar_lea.hbm %s1231_s5, %s665_s10  ;;  %s1169_s29 = scalar_lea.sflag [#allocation5], %s279_s9 }
 0x1f2   : > { %s840_s30 = scalar_lea.vmem %s1165_s28, 256  ;;  %s951_s24 = smov [#allocation4]  }
 0x1f3   : > { %p841_p6 = scmp.ne.s32.totalorder %s1165_s28, %s840_s30  ;;  %s844_s8 = sshll.u32 %s951_s24, 4  ;;  %s845_s8 = int_to_ptr.vmem [resolvable:$false] %s844_s8 }
 0x1f4   : > { %s846_s23 = scalar_lea.vmem %s845_s8, 512  ;;  %p847_p10 = scmp.lt.s32.totalorder %s1165_s28, %s845_s8 }
 0x1f5   : > { %p842_p8 = pnand %p841_p6, %p1056_p7  ;;  %p848_p11 = scmp.lt.s32.totalorder %s846_s23, %s840_s30 }
 0x1f7   : > { %p843_p9 = pneg %p842_p8  ;;  %p849_p13 = por %p848_p11, %p847_p10 }
 0x1f9   : > { %p850_p0 = pnand %p849_p13, %p843_p9 }
 0x1fb   : > { %853 = shalt.err (!%p850_p0)
}
 0x1fc   : > { %s854_s9 = scalar_lea.hbm %s1162_s17, 256  ;;  %s858_s13 = scalar_lea.hbm %s1231_s5, 512 }
 0x1fd   : > { %p855_p1 = scmp.ne.s32.totalorder %s1162_s17, %s854_s9  ;;  %p859_p4 = scmp.lt.s32.totalorder %s1162_s17, %s1231_s5 }
 0x1fe   : > { %p860_p5 = scmp.lt.s32.totalorder %s858_s13, %s854_s9 }
 0x1ff   : > { %p856_p2 = pnand %p855_p1, %p1056_p7 }
 0x200   : > { %p861_p6 = por %p860_p5, %p859_p4 }
 0x201   : > { %p857_p3 = pneg %p856_p2 }
 0x203   : > { %p862_p8 = pnand %p861_p6, %p857_p3 }
 0x205   : > { %865 = shalt.err (!%p862_p8)
}
 0x206   : > { %s952_s6 = smov 128   ;;  %s953_s30 = smov 8  }
 0x207   : > { %750 = dma.vmem_to_hbm [thread:$0]  (%p1056_p7), %s1165_s28, 256, %s1162_s17, %s1169_s29, %s952_s6, %s952_s6, %s953_s30  }
 0x208 PF: > { %p756_p9 = scmp.ge.s32.totalorder %s948_s27, 2  ;;  %s559_s24 = sand.u32 1, %s912_s18  }
 0x209   : > { %s560_s8 = scalar_lea.sflag [#allocation5], %s559_s24 }
 0x20a   : > { %p753_p10 = pnand %p756_p9, %p1064_p12 }
 0x20c   : > { %p754_p11 = pneg %p753_p10 }
 0x20e   : > { %907 = dma.done.wait (%p754_p11), %s560_s8, 256  }
 0x20f   : > { %909 = vsyncadd (%p754_p11), %s560_s8, 4294967040  ;;  %s18_s27 = sadd.s32 1, %s948_s27   ;;  %s1239_s11 = sld [smem:[#allocation7_spill]] }
 0x210   : > { %p15_p13 = scmp.ge.s32.totalorder %s18_s27, 10   ;;  %s1240_s17 = sld [smem:[#allocation8_spill]] }
 0x211   : > { %s1241_s18 = smov %s916_s19  ;;  %s1242_s19 = smov %s920_s20 }
 0x212   : > { %s1243_s20 = smov %s1069_s15  ;;  %s1244_s21 = smov %s928_s22 }
 0x213   : > { %s1245_s22 = smov %s1072_s16  ;;  %s1246_s23 = smov %s940_s25 }
 0x214   : > { %s1247_s24 = smov %s944_s26  ;;  %17 = sbr.rel (!%p15_p13) target bundleno = 6 (0x6), region = 114 }
 0x215   : > { %s1248_s25 = smov %s1239_s11 }
 0x216   : > { %s1249_s26 = smov %s1240_s17 }
 0x219   :  { %565 = vsyncpa [#allocation5], 1 }
 0x21a   :  { %567 = vsyncpa [#allocation5 + $0x1], 1 }

</bundles_post_ra>
